<compile_context>
chip_gen: v7x
topology: tpu7x:2x2x1
jax: 0.10.0
libtpu: 0.0.40
codegen_flags: <defaults>
</compile_context>

<pallas_src>
import jax
import jax.numpy as jnp
from jax.experimental import pallas as pl
from jax.experimental.pallas import tpu as pltpu


def _round_up(x, m):
    return ((x + m - 1) // m) * m


def _vmem_limit_bytes():
    """Generation-dependent VMEM limit (review: do not hard-code 32 MiB)."""
    try:
        cap = int(pltpu.get_tpu_info().vmem_capacity_bytes)
    except Exception:
        cap = 64 * 1024 * 1024          # v7x per-TensorCore worst case
    return int(min(cap * 3 // 4, 100 * 1024 * 1024))


def _pick_tm(M, Kp, TN, budget_bytes):
    """Largest multiple-of-8 row tile whose double-buffered pipeline fits VMEM."""
    fixed = 2 * (Kp * TN * 2 + TN * 4)          # weight + bias blocks (bf16 / f32)
    per_row = 2 * (Kp * 2 + TN * 4)             # 2x-buffered bf16 patches + f32 out
    avail = max(budget_bytes - fixed, 8 * per_row)
    tm = (avail // per_row) // 8 * 8
    return int(max(8, min(tm, 2048, _round_up(M, 8))))


def convblock_gemm_kernel(p_ref, w_ref, b_ref, o_ref):
    # p_ref: (TM, Kp)  bf16 pre-activation patch rows
    # w_ref: (Kp, TN)  bf16 banded weight tile
    # b_ref: (1,  TN)  f32 bias (per folded (w_out, cout) lane)
    # o_ref: (TM, TN)  f32 lane-dense output tile
    x = jnp.maximum(p_ref[...], 0)                         # pre-activation ReLU
    acc = jax.lax.dot_general(
        x, w_ref[...],
        dimension_numbers=(((1,), (0,)), ((), ())),
        preferred_element_type=jnp.float32)                # bf16 x bf16 -> f32 acc
    o_ref[...] = (acc + b_ref[...]).astype(o_ref.dtype)


def _build_banded_weight(weight, Wo, stride, Wspan):
    """(Cout,Cin,KH,KW) -> (KH*Wspan*Cin, Wo*Cout) Toeplitz-in-W GEMM matrix."""
    Cout, Cin, KH, KW = weight.shape
    w = jnp.transpose(weight, (2, 3, 1, 0))                 # (KH, KW, Cin, Cout)
    w_out = jnp.arange(Wo)
    w_in = jnp.arange(Wspan)
    kw_idx = w_in[None, :] - stride * w_out[:, None]        # (Wo, Wspan)
    valid = (kw_idx >= 0) & (kw_idx < KW)
    kw_clip = jnp.clip(kw_idx, 0, KW - 1)
    g = w[:, kw_clip, :, :]                                  # (KH, Wo, Wspan, Cin, Cout)
    g = jnp.where(valid[None, :, :, None, None], g, 0.0)
    g = jnp.transpose(g, (0, 2, 3, 1, 4))                    # (KH, Wspan, Cin, Wo, Cout)
    return g.reshape(KH * Wspan * Cin, Wo * Cout)


def conv_block_forward(x_nchw, weight, bias, *, stride=1, padding=1):
    """Pre-activation ConvBlock forward: Conv2d(relu(x)).

    x_nchw:  (N, Cin, H, W)       float32, NCHW (PyTorch layout)
    weight:  (Cout, Cin, KH, KW)  float32, PyTorch Conv2d layout
    bias:    (Cout,)              float32
    returns: (N, Cout, Ho, Wo)    float32
    """
    N, Cin, H, W = x_nchw.shape
    Cout, Cin_w, KH, KW = weight.shape
    assert Cin_w == Cin, "channel mismatch"
    Ho = (H + 2 * padding - KH) // stride + 1
    Wo = (W + 2 * padding - KW) // stride + 1
    assert Ho > 0 and Wo > 0, "invalid output spatial size"

    Wspan = (Wo - 1) * stride + KW          # input columns actually touched
    K = KH * Wspan * Cin                    # GEMM contraction dim
    Np = Wo * Cout                          # GEMM output dim (W folded with Cout)
    M = N * Ho                              # one GEMM row per output image row

    # ---- light im2col: duplicate along H only (KH x); W & Cin stay fused ----
    x_nhwc = jnp.transpose(x_nchw, (0, 2, 3, 1))
    x_pad = jnp.pad(
        x_nhwc, ((0, 0), (padding, padding), (padding, padding), (0, 0)))
    taps = [x_pad[:, kh:kh + (Ho - 1) * stride + 1:stride, :Wspan, :]
            for kh in range(KH)]
    A = jnp.stack(taps, axis=2).reshape(M, K).astype(jnp.bfloat16)

    Bm = _build_banded_weight(weight, Wo, stride, Wspan).astype(jnp.bfloat16)
    b_row = jnp.tile(bias, (Wo,)).astype(jnp.float32)        # (Np,), (w_out, cout) order

    # ---- pad to MXU / lane friendly shapes, derive tiles ---------------------
    Kp = _round_up(K, 128)                   # aligned contraction (<=18% pad here)
    Npad = _round_up(Np, 128)                # lane-dense output, real data + <128 pad
    TN = 128                                 # output-column tile (v5e MXU width)
    for cand in (512, 256):                  # wider tiles for v6e/v7x's 256-wide MXU
        if Npad % cand == 0:
            TN = cand
            break
    vmem_limit = _vmem_limit_bytes()
    TM = _pick_tm(M, Kp, TN, int(vmem_limit * 0.6))
    Mp = _round_up(M, TM)

    A_p = jnp.pad(A, ((0, Mp - M), (0, Kp - K)))
    B_p = jnp.pad(Bm, ((0, Kp - K), (0, Npad - Np)))
    b_p = jnp.pad(b_row, (0, Npad - Np)).reshape(1, Npad)

    out_p = pl.pallas_call(
        convblock_gemm_kernel,
        out_shape=jax.ShapeDtypeStruct((Mp, Npad), jnp.float32),
        grid_spec=pltpu.PrefetchScalarGridSpec(
            num_scalar_prefetch=0,
            grid=(Mp // TM, Npad // TN),
            in_specs=[
                pl.BlockSpec((TM, Kp), lambda i, j: (i, 0)),   # patches: row tile
                pl.BlockSpec((Kp, TN), lambda i, j: (0, j)),   # banded weight tile
                pl.BlockSpec((1, TN), lambda i, j: (0, j)),    # bias tile
            ],
            out_specs=pl.BlockSpec((TM, TN), lambda i, j: (i, j)),
        ),
        compiler_params=pltpu.CompilerParams(
            dimension_semantics=("parallel", "parallel"),   # both axes split across TCs
            vmem_limit_bytes=vmem_limit,
        ),
    )(A_p, B_p, b_p)

    # ---- strip padding, unfold W, back to NCHW -------------------------------
    out = out_p[:M, :Np].reshape(N, Ho, Wo, Cout)
    return jnp.transpose(out, (0, 3, 1, 2))


def _reference(x_nchw, weight, bias, *, stride=1, padding=1,
               operand_dtype=jnp.float32):
    # Pure-JAX reference (XLA conv) for correctness checks.
    xr = jnp.maximum(x_nchw, 0.0).astype(operand_dtype)
    w = weight.astype(operand_dtype)
    out = jax.lax.conv_general_dilated(
        xr, w,
        window_strides=(stride, stride),
        padding=((padding, padding), (padding, padding)),
        dimension_numbers=("NCHW", "OIHW", "NCHW"),
        preferred_element_type=jnp.float32)
    return out + bias[None, :, None, None]


if __name__ == "__main__":
    key = jax.random.PRNGKey(0)
    k_x, k_w, k_b = jax.random.split(key, 3)

    N, Cin, H, W = 2, 4, 16, 16
    Cout, KH, KW = 8, 3, 3

    x = jax.random.normal(k_x, (N, Cin, H, W), dtype=jnp.float32)
    # Deterministic synthetic parameters (PyTorch-style uniform fan-in init).
    fan_in = Cin * KH * KW
    bound = 1.0 / (fan_in ** 0.5)
    weight = jax.random.uniform(k_w, (Cout, Cin, KH, KW), jnp.float32, -bound, bound)
    bias = jax.random.uniform(k_b, (Cout,), jnp.float32, -bound, bound)

    out = jax.block_until_ready(conv_block_forward(x, weight, bias))
    assert out.shape == (N, Cout, H, W)

    # Tight check vs a reference with the same bf16-operand / f32-accum numerics.
    ref_bf16 = jax.block_until_ready(
        _reference(x, weight, bias, operand_dtype=jnp.bfloat16))
    assert jnp.allclose(out, ref_bf16, atol=2e-3, rtol=2e-3), \
        "mismatch vs bf16-operand reference conv"

    # Loose sanity check vs the full-f32 reference (bf16 operand rounding only).
    ref_f32 = jax.block_until_ready(_reference(x, weight, bias))
    assert jnp.allclose(out, ref_f32, atol=5e-2, rtol=5e-2), \
        "mismatch vs f32 reference conv"

    print("KERNEL_OK")
</pallas_src>

<mosaic_0001>
module attributes {stable_mosaic.version = 11 : i64} {
  func.func @convblock_gemm_kernel(%arg0: i32, %arg1: i32, %arg2: memref<32x256xbf16, #tpu.memory_space<vmem>>, %arg3: memref<256x128xbf16, #tpu.memory_space<vmem>>, %arg4: memref<1x128xf32, #tpu.memory_space<vmem>>, %arg5: memref<32x128xf32, #tpu.memory_space<vmem>>) attributes {dimension_semantics = [#tpu.dimension_semantics<parallel>, #tpu.dimension_semantics<parallel>], iteration_bounds = array<i64: 1, 1>, scalar_prefetch = 0 : i64, scratch_operands = 0 : i64, tpu.core_type = #tpu.core_type<tc>, window_params = [{transform_indices = @transform_0, window_bounds = array<i64: 32, 256>}, {transform_indices = @transform_1, window_bounds = array<i64: 256, 128>}, {transform_indices = @transform_2, window_bounds = array<i64: 1, 128>}, {transform_indices = @transform_3, window_bounds = array<i64: 32, 128>}]} {
    %c0 = arith.constant 0 : index
    %c0_0 = arith.constant 0 : index
    %0 = vector.load %arg2[%c0, %c0_0] : memref<32x256xbf16, #tpu.memory_space<vmem>>, vector<32x256xbf16>
    %cst = arith.constant 0.000000e+00 : bf16
    %1 = vector.broadcast %cst : bf16 to vector<32x256xbf16>
    %2 = arith.maximumf %0, %1 : vector<32x256xbf16>
    %c0_1 = arith.constant 0 : index
    %c0_2 = arith.constant 0 : index
    %3 = vector.load %arg3[%c0_1, %c0_2] : memref<256x128xbf16, #tpu.memory_space<vmem>>, vector<256x128xbf16>
    %cst_3 = arith.constant dense<0.000000e+00> : vector<32x128xf32>
    %4 = tpu.matmul %2, %3, %cst_3 {dimension_numbers = #tpu.dot_dimension_numbers<[1], [0], [0], [1], [0, 0, 1, 1], [], []>} : vector<32x256xbf16>, vector<256x128xbf16>, vector<32x128xf32> -> vector<32x128xf32>
    %c0_4 = arith.constant 0 : index
    %c0_5 = arith.constant 0 : index
    %5 = vector.load %arg4[%c0_4, %c0_5] : memref<1x128xf32, #tpu.memory_space<vmem>>, vector<1x128xf32>
    %6 = vector.broadcast %5 : vector<1x128xf32> to vector<32x128xf32>
    %7 = arith.addf %4, %6 : vector<32x128xf32>
    %c0_6 = arith.constant 0 : index
    %c0_7 = arith.constant 0 : index
    %8 = vector.load %arg5[%c0_6, %c0_7] : memref<32x128xf32, #tpu.memory_space<vmem>>, vector<32x128xf32>
    tpu.vector_store %arg5[%c0_6, %c0_7], %7 {strides = array<i32>} : memref<32x128xf32, #tpu.memory_space<vmem>>, vector<32x128xf32>,
    return
  }
  func.func @transform_0(%arg0: i32, %arg1: i32) -> (i32, i32) {
    %c0_i32 = arith.constant 0 : i32
    %c0_i32_0 = arith.constant 0 : i32
    return %arg0, %c0_i32 : i32, i32
  }
  func.func @transform_1(%arg0: i32, %arg1: i32) -> (i32, i32) {
    %c0_i32 = arith.constant 0 : i32
    %c0_i32_0 = arith.constant 0 : i32
    return %c0_i32, %arg1 : i32, i32
  }
  func.func @transform_2(%arg0: i32, %arg1: i32) -> (i32, i32) {
    %c0_i32 = arith.constant 0 : i32
    %c0_i32_0 = arith.constant 0 : i32
    return %c0_i32, %arg1 : i32, i32
  }
  func.func @transform_3(%arg0: i32, %arg1: i32) -> (i32, i32) {
    %c0_i32 = arith.constant 0 : i32
    return %arg0, %arg1 : i32, i32
  }
}

</mosaic_0001>

<bundles_post_ra>
// kernel: tpu_custom_call.1
= control target key start
LH: loop header
LB: loop body
LE: loop exit
PB: predicated region body
PF: predicated region fallthrough
CT: control target
= control target key end

     0   :  { %8 = vsyncpa [#allocation3], 0  ;;  %s512_s0 = inlined_call_operand.hbm [shape: bf16[32,256], index: 0, kind: input, shape index: {}]   ;;  %s513_s1 = inlined_call_operand.hbm [shape: bf16[256,128], index: 1, kind: input, shape index: {}]   ;;  %s514_s2 = inlined_call_operand.vmem [shape: f32[1,128], index: 2, kind: input, shape index: {}]   ;;  %s515_s3 = inlined_call_operand.hbm [shape: f32[32,128], index: 3, kind: output, shape index: {}]  }
   0x1   :  { %9 = vsyncpa [#allocation6], 0 }
   0x2   :  { %10 = vsyncpa [#allocation4], 0  ;;  %s439_s12 = smov [#allocation2]   ;;  %s367_s16 = scalar_lea.hbm %s512_s0, 512 }
   0x3   :  { %s16_s13 = sshll.u32 %s439_s12, 4  ;;  %p368_p0 = scmp.ne.s32.totalorder %s512_s0, %s367_s16  ;;  %s17_s13 = int_to_ptr.vmem [resolvable:$true] %s16_s13 }
   0x4   :  { %p371_p1 = scmp.lt.u32.totalorder %s367_s16, %s512_s0 }
   0x6   :  { %p373_p2 = pnand %p371_p1, %p368_p0 }
   0x8   :  { %376 = shalt.err (!%p373_p2)
}
   0x9   :  { %s377_s21 = scalar_lea.vmem %s17_s13, 512  ;;  %p382_p4 = scmp.lt.s32.totalorder %s17_s13, %s17_s13 }
   0xa   :  { %p378_p3 = scmp.ne.s32.totalorder %s17_s13, %s377_s21  ;;  %p383_p5 = scmp.lt.s32.totalorder %s377_s21, %s377_s21 }
   0xc   :  { %p384_p6 = por %p383_p5, %p382_p4 }
   0xe   :  { %p385_p7 = pnand %p384_p6, %p378_p3 }
  0x10   :  { %388 = shalt.err (!%p385_p7)
}
  0x11   :  { %s440_s22 = smov 128   ;;  %s441_s23 = smov 8  }
  0x12   :  { %22 = dma.hbm_to_vmem [thread:$0]  %s512_s0, 512, %s17_s13, [#allocation3], %s440_s22, %s440_s22, %s441_s23  }
  0x13   :  { %s442_s26 = smov [#allocation5]   ;;  %s389_s30 = scalar_lea.hbm %s513_s1, 2048 }
  0x14   :  { %s28_s27 = sshll.u32 %s442_s26, 4  ;;  %p390_p8 = scmp.ne.s32.totalorder %s513_s1, %s389_s30  ;;  %s29_s27 = int_to_ptr.vmem [resolvable:$true] %s28_s27 }
  0x15   :  { %p393_p9 = scmp.lt.u32.totalorder %s389_s30, %s513_s1 }
  0x17   :  { %p395_p10 = pnand %p393_p9, %p390_p8 }
  0x19   :  { %398 = shalt.err (!%p395_p10)
}
  0x1a   :  { %s399_s8 = scalar_lea.vmem %s29_s27, 2048  ;;  %p404_p12 = scmp.lt.s32.totalorder %s29_s27, %s29_s27 }
  0x1b   :  { %p400_p11 = scmp.ne.s32.totalorder %s29_s27, %s399_s8  ;;  %p405_p13 = scmp.lt.s32.totalorder %s399_s8, %s399_s8 }
  0x1d   :  { %p406_p0 = por %p405_p13, %p404_p12 }
  0x1f   :  { %p407_p1 = pnand %p406_p0, %p400_p11 }
  0x21   :  { %410 = shalt.err (!%p407_p1)
}
  0x22   :  { %s443_s0 = smov 64   ;;  %s444_s9 = smov 4  }
  0x23   :  { %34 = dma.hbm_to_vmem [thread:$0]  %s513_s1, 2048, %s29_s27, [#allocation6], %s443_s0, %s443_s0, %s444_s9  }
  0x24   :  { %433 = dma.done.wait [#allocation3], 512  }
  0x25   :  { %434 = vsyncadd [#allocation3], 4294966784 }
  0x26   :  { %435 = dma.done.wait [#allocation6], 2048  }
  0x27   :  { %436 = vsyncadd [#allocation6], 4294965248  ;;  %v351_v0 = vld [vmem:[#allocation5 + $0x40] sm:$0xff]   ;;  %v353_v2 = vld [vmem:[#allocation5 + $0x48] sm:$0xff]   ;;  %v445_v14 = vmov 0   ;;  %s446_s13 = smov [#allocation7]  }
  0x28   :  { %v352_v1 = vld [vmem:[#allocation5] sm:$0xff]   ;;  %299 = vmatprep.subr.bf16.mxu0 %v351_v0  ;;  %327 = vmatprep.subr.bf16.mxu1 %v351_v0  ;;  %v354_v3 = vld [vmem:[#allocation5 + $0x8] sm:$0xff]   ;;  %v355_v4 = vld [vmem:[#allocation5 + $0x50] sm:$0xff]   ;;  %s265_s14 = sshll.u32 %s446_s13, 4  ;;  %s266_s14 = int_to_ptr.vmem [resolvable:$true] %s265_s14 }
  0x29   :  { %300 = vmatpush3.bf16.msra.mxu0 %v352_v1  ;;  %335 = vmatpush3.bf16.msra.mxu1 %v352_v1  ;;  %v356_v5 = vld [vmem:[#allocation5 + $0x10] sm:$0xff]   ;;  %v357_v6 = vld [vmem:[#allocation5 + $0x58] sm:$0xff]   ;;  %v359_v8 = vld [vmem:[#allocation5 + $0x60] sm:$0xff]   ;;  %p416_p3 = scmp.lt.s32.totalorder %s266_s14, %s266_s14 }
  0x2a   :  { %301 = vmatprep.subr.bf16.mxu0 %v353_v2  ;;  %328 = vmatprep.subr.bf16.mxu1 %v353_v2  ;;  %v358_v7 = vld [vmem:[#allocation5 + $0x18] sm:$0xff]   ;;  %v360_v9 = vld [vmem:[#allocation5 + $0x20] sm:$0xff]   ;;  %v361_v10 = vld [vmem:[#allocation5 + $0x68] sm:$0xff]  }
  0x2b   :  { %v44_v11 = vld [vmem:[#allocation2] sm:$0xff]  ;;  %v45_v12 = vld [vmem:[#allocation2 + $0x8] sm:$0xff]  ;;  %v46_v13 = vld [vmem:[#allocation2 + $0x10] sm:$0xff] }
  0x2c   :  { %v48_v15 = vmax.bf16 %v445_v14, %v44_v11  ;;  %v49_v16 = vmax.bf16 %v445_v14, %v45_v12  ;;  %v47_v17 = vld [vmem:[#allocation2 + $0x18] sm:$0xff]  ;;  %v50_v18 = vmax.bf16 %v445_v14, %v46_v13  ;;  %v362_v20 = vld [vmem:[#allocation5 + $0x28] sm:$0xff]   ;;  %v363_v22 = vld [vmem:[#allocation5 + $0x70] sm:$0xff]  }
  0x2d   :  { %302 = vmatpush3.bf16.msra.mxu0 %v354_v3  ;;  %336 = vmatpush3.bf16.msra.mxu1 %v354_v3  ;;  %v51_v19 = vmax.bf16 %v445_v14, %v47_v17  ;;  %v364_v24 = vld [vmem:[#allocation5 + $0x30] sm:$0xff]   ;;  %v365_v25 = vld [vmem:[#allocation5 + $0x78] sm:$0xff]   ;;  %v278_v31 = vld [vmem:[%s514_s2] ss:$0 sm:$0xff]  ;;  %s411_s2 = scalar_lea.vmem %s266_s14, 512 }
  0x2e   :  { %303 = vmatprep.subr.bf16.mxu0 %v355_v4  ;;  %329 = vmatprep.subr.bf16.mxu1 %v355_v4  ;;  %v280_v21 = vcombine.high %v48_v15, %v49_v16  ;;  %v366_v26 = vld [vmem:[#allocation5 + $0x38] sm:$0xff]   ;;  %v279_v27 = vcombine.low %v48_v15, %v49_v16  ;;  %p412_p2 = scmp.ne.s32.totalorder %s266_s14, %s411_s2  ;;  %p417_p4 = scmp.lt.s32.totalorder %s411_s2, %s411_s2 }
  0x2f   :  { %v282_v23 = vcombine.high %v50_v18, %v51_v19  ;;  %v281_v28 = vcombine.low %v50_v18, %v51_v19 }
  0x30   :  { %239 = vmatprep.mubr.bf16.mxu0 %v280_v21  ;;  %p418_p5 = por %p417_p4, %p416_p3 }
  0x31   :  { %304 = vmatpush3.bf16.msra.mxu0 %v356_v5  ;;  %337 = vmatpush3.bf16.msra.mxu1 %v356_v5 }
  0x32   :  { %305 = vmatprep.subr.bf16.mxu0 %v357_v6  ;;  %330 = vmatprep.subr.bf16.mxu1 %v357_v6  ;;  %p419_p6 = pnand %p418_p5, %p412_p2 }
  0x33   :  { %247 = vmatprep.mubr.bf16.mxu1 %v282_v23 }
  0x35   :  { %306 = vmatpush3.bf16.msra.mxu0 %v358_v7  ;;  %338 = vmatpush3.bf16.msra.mxu1 %v358_v7 }
  0x36   :  { %307 = vmatprep.subr.bf16.mxu0 %v359_v8  ;;  %331 = vmatprep.subr.bf16.mxu1 %v359_v8 }
  0x39   :  { %308 = vmatpush3.bf16.msra.mxu0 %v360_v9  ;;  %339 = vmatpush3.bf16.msra.mxu1 %v360_v9 }
  0x3a   :  { %309 = vmatprep.subr.bf16.mxu0 %v361_v10  ;;  %332 = vmatprep.subr.bf16.mxu1 %v361_v10 }
  0x3d   :  { %310 = vmatpush3.bf16.msra.mxu0 %v362_v20  ;;  %340 = vmatpush3.bf16.msra.mxu1 %v362_v20 }
  0x3e   :  { %311 = vmatprep.subr.bf16.mxu0 %v363_v22  ;;  %333 = vmatprep.subr.bf16.mxu1 %v363_v22 }
  0x41   :  { %312 = vmatpush3.bf16.msra.mxu0 %v364_v24  ;;  %341 = vmatpush3.bf16.msra.mxu1 %v364_v24 }
  0x42   :  { %313 = vmatprep.subr.bf16.mxu0 %v365_v25  ;;  %334 = vmatprep.subr.bf16.mxu1 %v365_v25 }
  0x45   :  { %314 = vmatpush3.bf16.msra.mxu0 %v366_v26  ;;  %342 = vmatpush3.bf16.msra.mxu1 %v366_v26 }
  0x48   :  { %240 = vmatmul.mubr.bf16.vlgmr.msra.gmra.mrb[0].mxu0 %v279_v27  ;;  %248 = vmatmul.mubr.bf16.vlgmr.msra.gmra.mrb[0].mxu1 %v281_v28 }
 0x11b   :  { %v315_v29 = vpop.f32.mrb[0].mxu0  ;;  %v321_v30 = vpop.f32.mrb[0].mxu1 }
 0x11c   :  { %v316_v32 = vpop.f32.mrb[1].mxu0  ;;  %v322_v33 = vpop.f32.mrb[1].mxu1 }
 0x11d   :  { %v317_v34 = vadd.f32 %v316_v32, %v315_v29  ;;  %v323_v35 = vadd.f32 %v322_v33, %v321_v30  ;;  %v318_v36 = vpop.f32.mrb[2].mxu0  ;;  %v324_v37 = vpop.f32.mrb[2].mxu1 }
 0x11e   :  { %v319_v38 = vpop.f32.mrb[3].mxu0  ;;  %v325_v39 = vpop.f32.mrb[3].mxu1 }
 0x11f   :  { %v242_v40 = vadd.f32 %v317_v34, %v278_v31  ;;  %v250_v41 = vadd.f32 %v323_v35, %v278_v31  ;;  %v320_v42 = vadd.f32 %v319_v38, %v318_v36  ;;  %v326_v43 = vadd.f32 %v325_v39, %v324_v37 }
 0x121   :  { %256 = vst [vmem:[#allocation7] sm:$0xff] %v242_v40  ;;  %258 = vst [vmem:[#allocation7 + $0x10] sm:$0xff] %v250_v41  ;;  %v245_v44 = vadd.f32 %v320_v42, %v278_v31  ;;  %v253_v45 = vadd.f32 %v326_v43, %v278_v31 }
 0x123   :  { %257 = vst [vmem:[#allocation7 + $0x8] sm:$0xff] %v245_v44  ;;  %259 = vst [vmem:[#allocation7 + $0x18] sm:$0xff] %v253_v45 }
 0x124   :  { %422 = shalt.err (!%p419_p6)
}
 0x125   :  { %s423_s17 = scalar_lea.hbm %s515_s3, 512 }
 0x126   :  { %p424_p7 = scmp.ne.s32.totalorder %s515_s3, %s423_s17  ;;  %p427_p8 = scmp.lt.u32.totalorder %s423_s17, %s515_s3 }
 0x128   :  { %p429_p9 = pnand %p427_p8, %p424_p7 }
 0x12a   :  { %432 = shalt.err (!%p429_p9)
}
 0x12b   :  { %271 = dma.vmem_to_hbm [thread:$0]  %s266_s14, 512, %s515_s3, [#allocation4], %s440_s22, %s440_s22, %s441_s23  }
 0x12c   :  { %437 = dma.done.wait [#allocation4], 512  }
 0x12d   :  { %438 = vsyncadd [#allocation4], 4294966784 }
 0x12e   :  { %275 = vsyncpa [#allocation3], 1 }
 0x12f   :  { %276 = vsyncpa [#allocation6], 1 }
 0x130   :  { %277 = vsyncpa [#allocation4], 1 }

</bundles_post_ra>
